<compile_context>
chip_gen: v6e
topology: v6e:2x2x1
jax: 0.10.0
libtpu: 0.0.40
codegen_flags: <defaults>
</compile_context>

<pallas_src>
import functools

import jax
import jax.numpy as jnp
from jax import lax
from jax.experimental import pallas as pl
from jax.experimental.pallas import tpu as pltpu

OUT_PAD = 128          # lane-dense output / weight-slab width (one full vreg row)


def _round_up(v, m):
    return (v + m - 1) // m * m


def _slab_offsets(d, out_pad=OUT_PAD):
    """Row offsets of each section inside the packed weight slab (8-aligned)."""
    r_w1 = 0                       # [d, out_pad]       fused layer-1 weight
    r_b1 = _round_up(d, 8)         # [1, out_pad]       fused layer-1 bias
    r_w2 = r_b1 + 8                # [out_pad, out_pad] block-diag layer-2 weight
    r_b2 = r_w2 + out_pad          # [1, out_pad]
    r_w3 = r_b2 + 8                # [out_pad, out_pad] block layer-3 weight
    r_b3 = r_w3 + out_pad          # [1, out_pad]
    rows = r_b3 + 8
    return r_w1, r_b1, r_w2, r_b2, r_w3, r_b3, rows


# ---------------------------------------------------------------------------
# One-time parameter packing (runs OUTSIDE the per-step jit, single DMA/call).
# ---------------------------------------------------------------------------
def pack_qnet_params(move_params, hold_params, attack_params, *,
                     node_dim, hidden_dim, move_dim, out_pad=OUT_PAD):
    """Pack ALL Move/Hold/Attack MLP weights into ONE [rows, 128] f32 slab.

    Lane layout of the hidden width (requires 4*H <= 128):
      [0:H) move hidden | [H:2H) hold hidden | [2H:3H) attack hidden
      [3H:4H) attack src projection (layer 1 only).
    Layer-3 output columns: [0:move_dim) move, move_dim hold,
      out_pad-1 (DED lane) per-edge attack logit (scattered afterwards).
    """
    d, h = node_dim, hidden_dim
    ded = out_pad - 1
    assert 4 * h <= out_pad, "fused layer-1 packing needs 4*hidden <= 128"
    assert move_dim + 1 <= ded

    wm1, bm1, wm2, bm2, wm3, bm3 = move_params
    wh1, bh1, wh2, bh2, wh3, bh3 = hold_params
    wa1, ba1, wa2, ba2, wa3, ba3 = attack_params

    _, r_b1, r_w2, r_b2, r_w3, r_b3, rows = _slab_offsets(d, out_pad)
    slab = jnp.zeros((rows, out_pad), jnp.float32)

    # Layer 1: one [d, 128] weight covering move | hold | attack-dst | attack-src.
    slab = slab.at[:d, 0:h].set(wm1)
    slab = slab.at[:d, h:2 * h].set(wh1)
    slab = slab.at[:d, 2 * h:3 * h].set(wa1[:d])      # dst half of the [2d, h] weight
    slab = slab.at[:d, 3 * h:4 * h].set(wa1[d:])      # src half
    slab = slab.at[r_b1, 0:h].set(bm1[0])
    slab = slab.at[r_b1, h:2 * h].set(bh1[0])
    slab = slab.at[r_b1, 2 * h:3 * h].set(ba1[0])     # attack bias rides on dst lanes

    # Layer 2: block-diagonal (move, hold, attack) inside a [128, 128] section.
    slab = slab.at[r_w2:r_w2 + h, 0:h].set(wm2)
    slab = slab.at[r_w2 + h:r_w2 + 2 * h, h:2 * h].set(wh2)
    slab = slab.at[r_w2 + 2 * h:r_w2 + 3 * h, 2 * h:3 * h].set(wa2)
    slab = slab.at[r_b2, 0:h].set(bm2[0])
    slab = slab.at[r_b2, h:2 * h].set(bh2[0])
    slab = slab.at[r_b2, 2 * h:3 * h].set(ba2[0])

    # Layer 3: move -> cols [0, move_dim), hold -> col move_dim, attack -> DED lane.
    slab = slab.at[r_w3:r_w3 + h, 0:move_dim].set(wm3)
    slab = slab.at[r_w3 + h:r_w3 + 2 * h, move_dim:move_dim + 1].set(wh3)
    slab = slab.at[r_w3 + 2 * h:r_w3 + 3 * h, ded:ded + 1].set(wa3)
    slab = slab.at[r_b3, 0:move_dim].set(bm3[0])
    slab = slab.at[r_b3, move_dim].set(bh3[0, 0])
    slab = slab.at[r_b3, ded].set(ba3[0, 0])
    return slab


# ---------------------------------------------------------------------------
# Fused Pallas kernel: move + hold + attack, one lane-dense output slab.
# ---------------------------------------------------------------------------
def qnet_fused_kernel(x_ref, idx_ref, w_ref, out_ref, *, hidden_dim):
    f32 = jnp.float32
    h = hidden_dim
    x = x_ref[...]                                   # [N, D] f32
    n, d = x.shape
    e = idx_ref.shape[0]
    out_pad = out_ref.shape[1]                       # 128
    ded = out_pad - 1
    _, r_b1, r_w2, r_b2, r_w3, r_b3, _ = _slab_offsets(d, out_pad)

    # Static slices of the single packed weight slab (all params = one DMA).
    w1 = w_ref[0:d, :]                               # [D, 128]
    b1 = w_ref[r_b1:r_b1 + 1, :]                     # [1, 128]
    w2 = w_ref[r_w2:r_w2 + out_pad, :]               # [128, 128]
    b2 = w_ref[r_b2:r_b2 + 1, :]
    w3 = w_ref[r_w3:r_w3 + out_pad, :]
    b3 = w_ref[r_b3:r_b3 + 1, :]

    # ---- Fused layer 1: move | hold | attack-dst | attack-src in ONE matmul ----
    y1 = jnp.dot(x, w1, preferred_element_type=f32) + b1            # [N, 128]
    # lanes: [0:2H) move/hold pre-act, [2H:3H) x@W_dst + b1a, [3H:4H) x@W_src

    # ---- Attack-edge gather by one-hot matmul (MXU) ----
    idx = idx_ref[...]                               # [E, 3] int32
    dst_col = idx[:, 0:1]                            # [E, 1] destination (ally) node
    src_col = idx[:, 1:2]                            # [E, 1] source (enemy) node
    col_col = idx[:, 2:3]                            # [E, 1] output column (move_dim+1+slot)

    node_iota = lax.broadcasted_iota(jnp.int32, (e, n), 1)
    onehot_dst = (dst_col == node_iota).astype(f32)                  # [E, N]
    onehot_src = (src_col == node_iota).astype(f32)                  # [E, N]

    gath_dst = jnp.dot(onehot_dst, y1, preferred_element_type=f32)   # [E, 128]
    gath_src = jnp.dot(onehot_src, y1, preferred_element_type=f32)   # [E, 128]
    # Align the src projection (lanes 3H:4H) onto the attack lanes (2H:3H); the
    # lane roll runs on the XLU (free slot) and avoids sub-128 lane slices/concats.
    gath_src = pltpu.roll(gath_src, out_pad - h, 1)
    lane_e = lax.broadcasted_iota(jnp.int32, (e, out_pad), 1)
    edge_block = jnp.where((lane_e >= 2 * h) & (lane_e < 3 * h),
                           gath_dst + gath_src, 0.0)                 # [E, 128]

    # ---- Stack node (move/hold) and edge (attack) rows: one relu, one slab ----
    lane_n = lax.broadcasted_iota(jnp.int32, (n, out_pad), 1)
    node_block = jnp.where(lane_n < 2 * h, y1, 0.0)                  # [N, 128]
    h1 = jnp.maximum(jnp.concatenate([node_block, edge_block], axis=0), 0.0)  # [N+E,128]

    # ---- Block-structured layers 2 & 3 shared by all three heads ----
    h2 = jnp.maximum(jnp.dot(h1, w2, preferred_element_type=f32) + b2, 0.0)   # [N+E,128]
    y3 = jnp.dot(h2, w3, preferred_element_type=f32) + b3                      # [N+E,128]
    # node rows: cols [0:move_dim) move, col move_dim hold, col DED junk, rest 0
    # edge rows: col DED per-edge attack logit, other cols junk (never read)

    # ---- Scatter per-edge attack logits into the dense [N, enemy-slot] table ----
    per_edge = y3[n:n + e, ded:ded + 1]                              # [E, 1]
    onehot_col = (col_col == lane_e).astype(f32)                     # [E, 128]
    # Contraction over the edge axis of the existing [E, N] one-hot (TN matmul).
    # NOTE: duplicate (dst, slot) pairs would SUM; the graph guarantees uniqueness.
    attack_slab = lax.dot_general(onehot_dst, per_edge * onehot_col,
                                  dimension_numbers=(((0,), (0,)), ((), ())),
                                  preferred_element_type=f32)        # [N, 128]

    movehold = jnp.where(lane_n == ded, 0.0, y3[:n, :])              # drop the junk lane
    out_ref[...] = (movehold + attack_slab).astype(out_ref.dtype)    # ONE full-width store


# ---------------------------------------------------------------------------
# Wrapper: index packing + pallas_call
# ---------------------------------------------------------------------------
def _full_spec(shape):
    # Whole-array block (full-extent blocks are legal regardless of (8,128) divisibility).
    nd = len(shape)
    return pl.BlockSpec(shape, lambda nd=nd: (0,) * nd)


@functools.partial(jax.jit,
                   static_argnames=("move_dim", "maximum_num_enemy", "hidden_dim"))
def qnet_actor_forward(node_feature, packed_weights, edge_src, edge_dst, edge_slot,
                       *, move_dim, maximum_num_enemy, hidden_dim):
    """Equivalent of QnetActor.forward(graph, node_feature, maximum_num_enemy, ...)."""
    n, d = node_feature.shape
    e = edge_dst.shape[0]
    out_width = move_dim + 1 + maximum_num_enemy
    assert out_width < OUT_PAD, "move+hold+enemy columns must leave room for the DED lane"
    assert 4 * hidden_dim <= OUT_PAD, "fused layer-1 packing needs 4*hidden <= 128"
    assert n % 8 == 0, "pad node count to a multiple of 8 sublanes"

    # One packed [E, 3] int32 edge-index array (dst | src | output column) = one DMA.
    edge_idx = jnp.stack(
        [edge_dst.astype(jnp.int32),
         edge_src.astype(jnp.int32),
         edge_slot.astype(jnp.int32) + (move_dim + 1)], axis=1)
    e_pad = _round_up(max(e, 8), 8)
    if e_pad != e:   # pad with -1: matches no node / no column, contributes exactly 0
        edge_idx = jnp.concatenate(
            [edge_idx, jnp.full((e_pad - e, 3), -1, jnp.int32)], axis=0)

    # TODO(synk): for many envs/agents per step add a leading batch grid axis with
    #   dimension_semantics=("parallel",) to use both v7x TensorCores; if N/E scale to
    #   large battles, tile the edge axis (the [E,N]/[E,128] one-hots grow O(E*N) and
    #   hit v7x's 64 MiB VMEM first) and consider bf16 weights/activations.  At
    #   N=16/E=24 the kernel is latency-bound and a grid-less call is optimal.
    out = pl.pallas_call(
        functools.partial(qnet_fused_kernel, hidden_dim=hidden_dim),
        out_shape=jax.ShapeDtypeStruct((n, OUT_PAD), jnp.float32),
        in_specs=[_full_spec(node_feature.shape),
                  _full_spec(edge_idx.shape),
                  _full_spec(packed_weights.shape)],
        out_specs=_full_spec((n, OUT_PAD)),
    )(node_feature.astype(jnp.float32), edge_idx, packed_weights)

    move_arg = out[:, :move_dim]
    hold_arg = out[:, move_dim:move_dim + 1]
    # TODO(synk): original AttackModule fills unused enemy slots via a DGL reduce with a
    # mask value; here unused (dst, slot) entries are left at 0.0.
    attack_arg = out[:, move_dim + 1:out_width]
    return move_arg, hold_arg, attack_arg


# ---------------------------------------------------------------------------
# Pure-JAX reference (mirrors the original module math) for validation.
# ---------------------------------------------------------------------------
def _mlp_ref(x, params):
    w1, b1, w2, b2, w3, b3 = params
    h = jnp.maximum(x @ w1 + b1, 0.0)
    h = jnp.maximum(h @ w2 + b2, 0.0)
    return h @ w3 + b3


def reference_forward(node_feature, move_params, hold_params, attack_params,
                      edge_src, edge_dst, edge_slot, move_dim, maximum_num_enemy):
    move = _mlp_ref(node_feature, move_params)
    hold = _mlp_ref(node_feature, hold_params)
    edge_feat = jnp.concatenate(
        [node_feature[edge_dst], node_feature[edge_src]], axis=-1)
    per_edge = _mlp_ref(edge_feat, attack_params)[:, 0]
    attack = jnp.zeros((node_feature.shape[0], maximum_num_enemy), jnp.float32)
    attack = attack.at[edge_dst, edge_slot].set(per_edge)
    return move, hold, attack


# ---------------------------------------------------------------------------
# Deterministic parameter construction (torch.nn.Linear-style init)
# ---------------------------------------------------------------------------
def make_linear(key, fan_in, fan_out):
    kw, kb = jax.random.split(key)
    bound = 1.0 / jnp.sqrt(jnp.float32(fan_in))
    w = jax.random.uniform(kw, (fan_in, fan_out), jnp.float32, -bound, bound)
    b = jax.random.uniform(kb, (1, fan_out), jnp.float32, -bound, bound)
    return w, b


def make_mlp_params(key, in_dim, hidden, out_dim):
    k1, k2, k3 = jax.random.split(key, 3)
    w1, b1 = make_linear(k1, in_dim, hidden)
    w2, b2 = make_linear(k2, hidden, hidden)
    w3, b3 = make_linear(k3, hidden, out_dim)
    return (w1, b1, w2, b2, w3, b3)


# ---------------------------------------------------------------------------
if __name__ == "__main__":
    conf = dict(
        use_concat_input=False,
        node_input_dim=16,
        init_node_dim=0,
        out_activation=None,
        hidden_activation="relu",
        num_neurons=[32, 32],
        spectral_norm=False,
        attack_edge_type_index=0,
        num_groups=1,
        pooling_op="mean",
        pooling_init=None,
        use_hold=True,
        use_tanh=False,
        use_noisy=False,
    )

    N = 16                       # total graph nodes (allies + enemies)
    D = conf["node_input_dim"]   # node feature dim
    H = conf["num_neurons"][0]   # hidden width
    MOVE_DIM = 4
    MAX_ENEMY = 3
    N_ALLY = 8

    key = jax.random.PRNGKey(0)
    kx, km, kh, ka = jax.random.split(key, 4)

    node_feature = jax.random.normal(kx, (N, D), jnp.float32)
    move_params = make_mlp_params(km, D, H, MOVE_DIM)       # MoveModule
    hold_params = make_mlp_params(kh, D, H, 1)              # HoldModule
    attack_params = make_mlp_params(ka, 2 * D, H, 1)        # AttackModule

    # Build the single weight slab ONCE (outside the per-step jit), reuse every step.
    packed_weights = pack_qnet_params(
        move_params, hold_params, attack_params,
        node_dim=D, hidden_dim=H, move_dim=MOVE_DIM)

    # Synthetic attack-range edge list: ally i has MAX_ENEMY enemies in range.
    edge_dst = jnp.repeat(jnp.arange(N_ALLY, dtype=jnp.int32), MAX_ENEMY)
    edge_slot = jnp.tile(jnp.arange(MAX_ENEMY, dtype=jnp.int32), N_ALLY)
    edge_src = N_ALLY + (edge_dst + edge_slot) % (N - N_ALLY)

    move_arg, hold_arg, attack_arg = qnet_actor_forward(
        node_feature, packed_weights, edge_src, edge_dst, edge_slot,
        move_dim=MOVE_DIM, maximum_num_enemy=MAX_ENEMY, hidden_dim=H)
    jax.block_until_ready((move_arg, hold_arg, attack_arg))

    assert move_arg.shape == (N, MOVE_DIM)
    assert hold_arg.shape == (N, 1)
    assert attack_arg.shape == (N, MAX_ENEMY)

    # Validate the fused/packed kernel against the straightforward reference.
    move_ref, hold_ref, attack_ref = reference_forward(
        node_feature, move_params, hold_params, attack_params,
        edge_src, edge_dst, edge_slot, MOVE_DIM, MAX_ENEMY)
    assert bool(jnp.allclose(move_arg, move_ref, atol=1e-4, rtol=1e-4))
    assert bool(jnp.allclose(hold_arg, hold_ref, atol=1e-4, rtol=1e-4))
    assert bool(jnp.allclose(attack_arg, attack_ref, atol=1e-4, rtol=1e-4))

    print("KERNEL_OK")
</pallas_src>

<mosaic_0001>
module attributes {stable_mosaic.version = 11 : i64} {
  func.func @qnet_fused_kernel(%arg0: memref<16x16xf32, #tpu.memory_space<vmem>>, %arg1: memref<24x3xi32, #tpu.memory_space<vmem>>, %arg2: memref<296x128xf32, #tpu.memory_space<vmem>>, %arg3: memref<16x128xf32, #tpu.memory_space<vmem>>) attributes {dimension_semantics = [], scalar_prefetch = 0 : i64, scratch_operands = 0 : i64, tpu.core_type = #tpu.core_type<tc>} {
    %c0 = arith.constant 0 : index
    %c0_0 = arith.constant 0 : index
    %0 = vector.load %arg0[%c0, %c0_0] : memref<16x16xf32, #tpu.memory_space<vmem>>, vector<16x16xf32>
    %c0_1 = arith.constant 0 : index
    %c0_2 = arith.constant 0 : index
    %1 = vector.load %arg2[%c0_1, %c0_2] : memref<296x128xf32, #tpu.memory_space<vmem>>, vector<16x128xf32>
    %c16 = arith.constant 16 : index
    %c0_3 = arith.constant 0 : index
    %2 = vector.load %arg2[%c16, %c0_3] : memref<296x128xf32, #tpu.memory_space<vmem>>, vector<1x128xf32>
    %c24 = arith.constant 24 : index
    %c0_4 = arith.constant 0 : index
    %3 = vector.load %arg2[%c24, %c0_4] : memref<296x128xf32, #tpu.memory_space<vmem>>, vector<128x128xf32>
    %c152 = arith.constant 152 : index
    %c0_5 = arith.constant 0 : index
    %4 = vector.load %arg2[%c152, %c0_5] : memref<296x128xf32, #tpu.memory_space<vmem>>, vector<1x128xf32>
    %c160 = arith.constant 160 : index
    %c0_6 = arith.constant 0 : index
    %5 = vector.load %arg2[%c160, %c0_6] : memref<296x128xf32, #tpu.memory_space<vmem>>, vector<128x128xf32>
    %c288 = arith.constant 288 : index
    %c0_7 = arith.constant 0 : index
    %6 = vector.load %arg2[%c288, %c0_7] : memref<296x128xf32, #tpu.memory_space<vmem>>, vector<1x128xf32>
    %cst = arith.constant dense<0.000000e+00> : vector<16x128xf32>
    %7 = tpu.matmul %0, %1, %cst {dimension_numbers = #tpu.dot_dimension_numbers<[1], [0], [0], [1], [0, 0, 1, 1], [], []>} : vector<16x16xf32>, vector<16x128xf32>, vector<16x128xf32> -> vector<16x128xf32>
    %8 = vector.broadcast %2 : vector<1x128xf32> to vector<16x128xf32>
    %9 = arith.addf %7, %8 : vector<16x128xf32>
    %c0_8 = arith.constant 0 : index
    %c0_9 = arith.constant 0 : index
    %10 = vector.load %arg1[%c0_8, %c0_9] : memref<24x3xi32, #tpu.memory_space<vmem>>, vector<24x3xi32>
    %11 = vector.extract_strided_slice %10 {offsets = [0, 0], sizes = [24, 1], strides = [1, 1]} : vector<24x3xi32> to vector<24x1xi32>
    %12 = vector.extract_strided_slice %10 {offsets = [0, 1], sizes = [24, 1], strides = [1, 1]} : vector<24x3xi32> to vector<24x1xi32>
    %13 = vector.extract_strided_slice %10 {offsets = [0, 2], sizes = [24, 1], strides = [1, 1]} : vector<24x3xi32> to vector<24x1xi32>
    %14 = tpu.iota {dimensions = array<i32: 1>} : vector<24x16xi32>
    %15 = vector.broadcast %11 : vector<24x1xi32> to vector<24x16xi32>
    %16 = arith.cmpi eq, %15, %14 : vector<24x16xi32>
    %17 = arith.extui %16 : vector<24x16xi1> to vector<24x16xi32>
    %18 = arith.sitofp %17 : vector<24x16xi32> to vector<24x16xf32>
    %19 = vector.broadcast %12 : vector<24x1xi32> to vector<24x16xi32>
    %20 = arith.cmpi eq, %19, %14 : vector<24x16xi32>
    %21 = arith.extui %20 : vector<24x16xi1> to vector<24x16xi32>
    %22 = arith.sitofp %21 : vector<24x16xi32> to vector<24x16xf32>
    %cst_10 = arith.constant dense<0.000000e+00> : vector<24x128xf32>
    %23 = tpu.matmul %18, %9, %cst_10 {dimension_numbers = #tpu.dot_dimension_numbers<[1], [0], [0], [1], [0, 0, 1, 1], [], []>} : vector<24x16xf32>, vector<16x128xf32>, vector<24x128xf32> -> vector<24x128xf32>
    %cst_11 = arith.constant dense<0.000000e+00> : vector<24x128xf32>
    %24 = tpu.matmul %22, %9, %cst_11 {dimension_numbers = #tpu.dot_dimension_numbers<[1], [0], [0], [1], [0, 0, 1, 1], [], []>} : vector<24x16xf32>, vector<16x128xf32>, vector<24x128xf32> -> vector<24x128xf32>
    %c96_i32 = arith.constant 96 : i32
    %25 = tpu.dynamic_rotate %24 by %c96_i32 dim 1 : vector<24x128xf32>, i32 -> vector<24x128xf32>
    %26 = tpu.iota {dimensions = array<i32: 1>} : vector<24x128xi32>
    %c64_i32 = arith.constant 64 : i32
    %27 = vector.broadcast %c64_i32 : i32 to vector<24x128xi32>
    %28 = arith.cmpi sge, %26, %27 : vector<24x128xi32>
    %c96_i32_12 = arith.constant 96 : i32
    %29 = vector.broadcast %c96_i32_12 : i32 to vector<24x128xi32>
    %30 = arith.cmpi slt, %26, %29 : vector<24x128xi32>
    %31 = arith.andi %28, %30 : vector<24x128xi1>
    %32 = arith.addf %23, %25 : vector<24x128xf32>
    %cst_13 = arith.constant 0.000000e+00 : f32
    %33 = vector.broadcast %cst_13 : f32 to vector<24x128xf32>
    %34 = arith.select %31, %32, %33 : vector<24x128xi1>, vector<24x128xf32>
    %35 = tpu.iota {dimensions = array<i32: 1>} : vector<16x128xi32>
    %c64_i32_14 = arith.constant 64 : i32
    %36 = vector.broadcast %c64_i32_14 : i32 to vector<16x128xi32>
    %37 = arith.cmpi slt, %35, %36 : vector<16x128xi32>
    %cst_15 = arith.constant 0.000000e+00 : f32
    %38 = vector.broadcast %cst_15 : f32 to vector<16x128xf32>
    %39 = arith.select %37, %9, %38 : vector<16x128xi1>, vector<16x128xf32>
    %40 = tpu.concatenate %39, %34 in 0 : vector<16x128xf32>, vector<24x128xf32> -> vector<40x128xf32>
    %cst_16 = arith.constant 0.000000e+00 : f32
    %41 = vector.broadcast %cst_16 : f32 to vector<40x128xf32>
    %42 = arith.maximumf %40, %41 : vector<40x128xf32>
    %cst_17 = arith.constant dense<0.000000e+00> : vector<40x128xf32>
    %43 = tpu.matmul %42, %3, %cst_17 {dimension_numbers = #tpu.dot_dimension_numbers<[1], [0], [0], [1], [0, 0, 1, 1], [], []>} : vector<40x128xf32>, vector<128x128xf32>, vector<40x128xf32> -> vector<40x128xf32>
    %44 = vector.broadcast %4 : vector<1x128xf32> to vector<40x128xf32>
    %45 = arith.addf %43, %44 : vector<40x128xf32>
    %cst_18 = arith.constant 0.000000e+00 : f32
    %46 = vector.broadcast %cst_18 : f32 to vector<40x128xf32>
    %47 = arith.maximumf %45, %46 : vector<40x128xf32>
    %cst_19 = arith.constant dense<0.000000e+00> : vector<40x128xf32>
    %48 = tpu.matmul %47, %5, %cst_19 {dimension_numbers = #tpu.dot_dimension_numbers<[1], [0], [0], [1], [0, 0, 1, 1], [], []>} : vector<40x128xf32>, vector<128x128xf32>, vector<40x128xf32> -> vector<40x128xf32>
    %49 = vector.broadcast %6 : vector<1x128xf32> to vector<40x128xf32>
    %50 = arith.addf %48, %49 : vector<40x128xf32>
    %51 = vector.extract_strided_slice %50 {offsets = [16, 127], sizes = [24, 1], strides = [1, 1]} : vector<40x128xf32> to vector<24x1xf32>
    %52 = vector.broadcast %13 : vector<24x1xi32> to vector<24x128xi32>
    %53 = arith.cmpi eq, %52, %26 : vector<24x128xi32>
    %54 = arith.extui %53 : vector<24x128xi1> to vector<24x128xi32>
    %55 = arith.sitofp %54 : vector<24x128xi32> to vector<24x128xf32>
    %56 = vector.broadcast %51 : vector<24x1xf32> to vector<24x128xf32>
    %57 = arith.mulf %56, %55 : vector<24x128xf32>
    %cst_20 = arith.constant dense<0.000000e+00> : vector<16x128xf32>
    %58 = tpu.matmul %18, %57, %cst_20 {dimension_numbers = #tpu.dot_dimension_numbers<[0], [0], [1], [1], [0, 1, 1, 1], [], []>} : vector<24x16xf32>, vector<24x128xf32>, vector<16x128xf32> -> vector<16x128xf32>
    %c127_i32 = arith.constant 127 : i32
    %59 = vector.broadcast %c127_i32 : i32 to vector<16x128xi32>
    %60 = arith.cmpi eq, %35, %59 : vector<16x128xi32>
    %61 = vector.extract_strided_slice %50 {offsets = [0, 0], sizes = [16, 128], strides = [1, 1]} : vector<40x128xf32> to vector<16x128xf32>
    %cst_21 = arith.constant 0.000000e+00 : f32
    %62 = vector.broadcast %cst_21 : f32 to vector<16x128xf32>
    %63 = arith.select %60, %62, %61 : vector<16x128xi1>, vector<16x128xf32>
    %64 = arith.addf %63, %58 : vector<16x128xf32>
    %c0_22 = arith.constant 0 : index
    %c0_23 = arith.constant 0 : index
    %65 = vector.load %arg3[%c0_22, %c0_23] : memref<16x128xf32, #tpu.memory_space<vmem>>, vector<16x128xf32>
    tpu.vector_store %arg3[%c0_22, %c0_23], %64 {strides = array<i32>} : memref<16x128xf32, #tpu.memory_space<vmem>>, vector<16x128xf32>,
    return
  }
}

</mosaic_0001>

<bundles_post_ra>
// kernel: qnet_actor_forward.1
= control target key start
LH: loop header
LB: loop body
LE: loop exit
PB: predicated region body
PF: predicated region fallthrough
CT: control target
= control target key end

     0   :  { %8 = vsyncpa [#allocation3], 0  ;;  %s1006_s12 = smov [#allocation2]   ;;  %s1213_s0 = inlined_call_operand.vmem [shape: f32[16,16], index: 0, kind: input, shape index: {}]   ;;  %s1214_s1 = inlined_call_operand.vmem [shape: s32[24,3], index: 1, kind: input, shape index: {}]   ;;  %s1215_s2 = inlined_call_operand.hbm [shape: f32[296,128], index: 2, kind: input, shape index: {}]   ;;  %s1216_s3 = inlined_call_operand.vmem [shape: f32[16,128], index: 3, kind: output, shape index: {}]  }
   0x1   :  { %s18_s13 = sshll.u32 %s1006_s12, 4  ;;  %s19_s13 = int_to_ptr.vmem [resolvable:$true] %s18_s13 }
   0x2   :  { %s992_s14 = scalar_lea.vmem %s19_s13, 4736  ;;  %p997_p1 = scmp.lt.s32.totalorder %s19_s13, %s19_s13 }
   0x3   :  { %p993_p0 = scmp.ne.s32.totalorder %s19_s13, %s992_s14  ;;  %p998_p2 = scmp.lt.s32.totalorder %s992_s14, %s992_s14 }
   0x5   :  { %p999_p3 = por %p998_p2, %p997_p1 }
   0x7   :  { %p1000_p4 = pnand %p999_p3, %p993_p0 }
   0x9   :  { %1003 = shalt.err (!%p1000_p4)
}
   0xa   :  { %s1007_s15 = smov 128   ;;  %s1008_s16 = smov 8  }
   0xb   :  { %24 = dma.hbm_to_vmem [thread:$0]  %s1215_s2, 4736, %s19_s13, [#allocation3], %s1007_s15, %s1007_s15, %s1008_s16  }
   0xc   :  { %1004 = dma.done.wait [#allocation3], 4736  }
   0xd   :  { %1005 = vsyncadd [#allocation3], 4294962560  ;;  %v1009_v0 = vmov 1   ;;  %v1010_v1 = vmov 0.0   ;;  %vm71_vm0 = vcmask 130048   ;;  %v31_v2 = vld [vmem:[#allocation2 + $0x8] sm:$0xff]  ;;  %v156_v11 = vlaneseq }
   0xe   :  { %976 = vset.pattern.permute.xlu0 %v1009_v0  ;;  %977 = vset.pattern.permute.xlu1 %v1009_v0  ;;  %v30_v3 = vld [vmem:[#allocation2] sm:$0xff]  ;;  %v29_v6 = vld [vmem:[%s1213_s0 + $0x8] sm:$0xff]  ;;  %v1056_v7 = vld [vmem:[%s1214_s1 + $0x10] sm:$0xff]  ;;  %v1011_v9 = vmov 0   ;;  %vm1012_vm1 = vmmov 0   ;;  %vm653_vm15 = vcmask 195584  }
   0xf   :  { %837 = vmatprep.subr.mxu1 %v1010_v1  ;;  %v28_v4 = vld [vmem:[%s1213_s0] sm:$0xff]  ;;  %830 = vmatprep.subr.mxu0 %v31_v2  ;;  %v1061_v8 = vld [vmem:[%s1214_s1 + $0x8] sm:$0xff]  ;;  %v1074_v13 = vand.u32 127, %v156_v11  ;;  %v747_v14 = vld [vmem:[#allocation2 + $0x10] ss:$0 sm:$0xff]  ;;  %s1013_s0 = smov 96  }
  0x10   :  { %834 = vmatprep.mubr.msk.f32.mxu0 %vm71_vm0, %v28_v4  ;;  %v1047_v5 = vld [vmem:[%s1214_s1] sm:$0xff]  ;;  %831 = vmatpush3.msra.mxu0 %v31_v2  ;;  %v48_v23 = vld [vmem:[#allocation2 + $0x90] sm:$0xff]  ;;  %v47_v25 = vld [vmem:[#allocation2 + $0x88] sm:$0xff] }
  0x11   :  { %177 = vperm.xlu0 %976, %v1047_v5   ;;  %832 = vmatprep.subr.mxu0 %v30_v3  ;;  %v46_v27 = vld [vmem:[#allocation2 + $0x80] sm:$0xff]  ;;  %v45_v30 = vld [vmem:[#allocation2 + $0x78] sm:$0xff]  ;;  %v44_v32 = vld [vmem:[#allocation2 + $0x70] sm:$0xff]  ;;  %vm384_vm8 = vcmp.lt.s32.totalorder %v1074_v13, 64  ;;  %vm289_vm9 = vcmp.ge.s32.totalorder %v1074_v13, 64  ;;  %vm290_vm10 = vcmp.lt.s32.totalorder %v1074_v13, 96 }
  0x12   :  { %183 = vperm.xlu1 %977, %v1056_v7   ;;  %833 = vmatpush3.msra.mxu0 %v30_v3  ;;  %v43_v34 = vld [vmem:[#allocation2 + $0x68] sm:$0xff]  ;;  %v42_v35 = vld [vmem:[#allocation2 + $0x60] sm:$0xff]  ;;  %v41_v36 = vld [vmem:[#allocation2 + $0x58] sm:$0xff] }
  0x13   :  { %835 = vmatmul.mubr.msk.f32.vlgmr.msra.gmra.mxu0 %vm71_vm0, %v29_v6  ;;  %850 = vmatprep.subr.mxu0 %v1010_v1  ;;  %v40_v37 = vld [vmem:[#allocation2 + $0x50] sm:$0xff]  ;;  %v39_v38 = vld [vmem:[#allocation2 + $0x48] sm:$0xff]  ;;  %v38_v39 = vld [vmem:[#allocation2 + $0x40] sm:$0xff] }
  0x14   :  { %841 = vmatprep.mubr.msk.f32.mxu1 %vm1012_vm1, %v1010_v1  ;;  %854 = vmatprep.mubr.msk.f32.mxu0 %vm1012_vm1, %v1010_v1  ;;  %v37_v40 = vld [vmem:[#allocation2 + $0x38] sm:$0xff]  ;;  %v36_v41 = vld [vmem:[#allocation2 + $0x30] sm:$0xff]  ;;  %v35_v42 = vld [vmem:[#allocation2 + $0x28] sm:$0xff] }
  0x15   :  { %180 = vperm.xlu0 %976, %v1061_v8   ;;  %v34_v43 = vld [vmem:[#allocation2 + $0x20] sm:$0xff]  ;;  %v33_v45 = vld [vmem:[#allocation2 + $0x18] sm:$0xff]  ;;  %v64_v50 = vld [vmem:[#allocation2 + $0x110] sm:$0xff] }
  0x16   :  { %978 = vset.pattern.permute.xlu1 %v1011_v9  ;;  %v65_v49 = vld [vmem:[#allocation2 + $0x118] sm:$0xff]  ;;  %v63_v51 = vld [vmem:[#allocation2 + $0x108] sm:$0xff]  ;;  %v62_v52 = vld [vmem:[#allocation2 + $0x100] sm:$0xff] }
  0x17   :  { %159 = vperm.xlu1 %978, %v1047_v5   ;;  %v61_v53 = vld [vmem:[#allocation2 + $0xf8] sm:$0xff]  ;;  %v60_v54 = vld [vmem:[#allocation2 + $0xf0] sm:$0xff]  ;;  %v59_v55 = vld [vmem:[#allocation2 + $0xe8] sm:$0xff] }
  0x18   :  { %v58_v56 = vld [vmem:[#allocation2 + $0xe0] sm:$0xff]  ;;  %v57_v57 = vld [vmem:[#allocation2 + $0xd8] sm:$0xff]  ;;  %v56_v58 = vld [vmem:[#allocation2 + $0xd0] sm:$0xff] }
  0x19   :  { %979 = vset.pattern.permute.xlu0 %v1011_v9  ;;  %v55_v59 = vld [vmem:[#allocation2 + $0xc8] sm:$0xff]  ;;  %v54_v60 = vld [vmem:[#allocation2 + $0xc0] sm:$0xff]  ;;  %v53_v61 = vld [vmem:[#allocation2 + $0xb8] sm:$0xff] }
  0x1a   :  { %162 = vperm.xlu0 %979, %v1061_v8   ;;  %v52_v62 = vld [vmem:[#allocation2 + $0xb0] sm:$0xff]  ;;  %v51_v63 = vld [vmem:[#allocation2 + $0xa8] sm:$0xff]  ;;  %v50_v0 = vld [vmem:[#allocation2 + $0xa0] sm:$0xff] }
  0x1b   :  { %165 = vperm.xlu1 %978, %v1056_v7   ;;  %vm1170_vm11 = vmand %vm289_vm9, %vm290_vm10 }
  0x8c   :  { %v178_v10 = vpop.permute.xlu0 %177 }
  0x8d   :  { %v184_v12 = vpop.permute.xlu1 %183  ;;  %vm185_vm2 = vcmp.eq.s32.totalorder %v178_v10, %v1074_v13 }
  0x8e   :  { %v753_v20 = vsel %vm185_vm2, 1.0, %v1010_v1  ;;  %vm187_vm6 = vcmp.eq.s32.totalorder %v184_v12, %v1074_v13 }
  0x8f   :  { %v755_v31 = vsel %vm187_vm6, 1.0, %v1010_v1 }
  0x90   :  { %v181_v15 = vpop.permute.xlu0 %180 }
  0x91   :  { %vm186_vm4 = vcmp.eq.s32.totalorder %v181_v15, %v1074_v13 }
  0x92   :  { %v160_v16 = vpop.permute.xlu1 %159  ;;  %v754_v28 = vsel %vm186_vm4, 1.0, %v1010_v1 }
  0x93   :  { %vm167_vm3 = vcmp.eq.s32.totalorder %v160_v16, %v1074_v13 }
  0x94   :  { %v1090_v24 = vsel %vm167_vm3, 1.0, %v1010_v1 }
  0x95   :  { %v163_v22 = vpop.permute.xlu0 %162 }
  0x96   :  { %vm168_vm5 = vcmp.eq.s32.totalorder %v163_v22, %v1074_v13  ;;  %v166_v26 = vpop.permute.xlu1 %165 }
  0x97   :  { %v1104_v29 = vsel %vm168_vm5, 1.0, %v1010_v1  ;;  %vm169_vm7 = vcmp.eq.s32.totalorder %v166_v26, %v1074_v13 }
  0x98   :  { %v1118_v33 = vsel %vm169_vm7, 1.0, %v1010_v1 }
  0xd3   :  { %v836_v17 = vpop.f32.mrf.mxu0 }
  0xd4   :  { %v1077_v18 = vadd.f32 %v836_v17, %v747_v14 }
  0xd5   :  { %v144_v19 = vpop.f32.mrf.mxu0 }
  0xd6   :  { %v1081_v21 = vadd.f32 %v747_v14, %v144_v19  ;;  %838 = vmatpush3.msra.mxu1 %v1077_v18  ;;  %851 = vmatpush3.msra.mxu0 %v1077_v18  ;;  %v386_v47 = vsel %vm384_vm8, %v1077_v18, 0.0  ;;  %v762_v18 = vld [vmem:[#allocation2 + $0x98] ss:$0 sm:$0xff] }
  0xd7   :  { %839 = vmatprep.subr.mxu1 %v1010_v1  ;;  %852 = vmatprep.subr.mxu0 %v1010_v1  ;;  %v388_v48 = vmax.f32 %v386_v47, 0.0 }
  0xd8   :  { %840 = vmatpush3.msra.mxu1 %v1081_v21  ;;  %853 = vmatpush3.msra.mxu0 %v1081_v21  ;;  %v385_v44 = vsel %vm384_vm8, %v1081_v21, 0.0 }
  0xd9   :  { %842 = vmatmul.mubr.msk.f32.vlgmr.msra.gmra.mxu1 %vm71_vm0, %v753_v20  ;;  %863 = vmatprep.subr.mxu1 %v1010_v1  ;;  %v387_v46 = vmax.f32 %v385_v44, 0.0 }
  0xda   :  { %864 = vmatpush3.msra.mxu1 %v48_v23  ;;  %844 = vmatprep.mubr.msk.f32.mxu1 %vm1012_vm1, %v1010_v1 }
  0xdb   :  { %865 = vmatprep.subr.mxu1 %v1010_v1  ;;  %855 = vmatmul.mubr.msk.f32.vlgmr.msra.gmra.mxu0 %vm71_vm0, %v1090_v24 }
  0xdc   :  { %866 = vmatpush3.msra.mxu1 %v47_v25  ;;  %857 = vmatprep.mubr.msk.f32.mxu0 %vm1012_vm1, %v1010_v1 }
  0xdd   :  { %845 = vmatmul.mubr.msk.f32.gmra.mxu1 %vm71_vm0, %v754_v28  ;;  %867 = vmatprep.subr.mxu1 %v1010_v1 }
  0xde   :  { %868 = vmatpush3.msra.mxu1 %v46_v27  ;;  %847 = vmatprep.mubr.msk.f32.mxu1 %vm1012_vm1, %v1010_v1 }
  0xdf   :  { %869 = vmatprep.subr.mxu1 %v1010_v1  ;;  %858 = vmatmul.mubr.msk.f32.gmra.mxu0 %vm71_vm0, %v1104_v29 }
  0xe0   :  { %870 = vmatpush3.msra.mxu1 %v45_v30  ;;  %860 = vmatprep.mubr.msk.f32.mxu0 %vm1012_vm1, %v1010_v1 }
  0xe1   :  { %848 = vmatmul.mubr.msk.f32.gmra.mxu1 %vm71_vm0, %v755_v31  ;;  %871 = vmatprep.subr.mxu1 %v1010_v1 }
  0xe2   :  { %872 = vmatpush3.msra.mxu1 %v44_v32  ;;  %895 = vmatprep.mubr.msk.f32.mxu1 %vm1012_vm1, %v1010_v1 }
  0xe3   :  { %873 = vmatprep.subr.mxu1 %v1010_v1  ;;  %861 = vmatmul.mubr.msk.f32.gmra.mxu0 %vm71_vm0, %v1118_v33  ;;  %vm735_vm0 = vcmp.eq.s32.totalorder %v1074_v13, 127 }
  0xe4   :  { %874 = vmatpush3.msra.mxu1 %v43_v34  ;;  %910 = vmatprep.subr.mxu0 %v1010_v1 }
  0xe5   :  { %875 = vmatprep.subr.mxu1 %v1010_v1  ;;  %942 = vmatprep.mubr.msk.f32.mxu0 %vm1012_vm1, %v1010_v1 }
  0xe6   :  { %876 = vmatpush3.msra.mxu1 %v42_v35  ;;  %911 = vmatpush3.msra.mxu0 %v65_v49 }
  0xe7   :  { %877 = vmatprep.subr.mxu1 %v1010_v1  ;;  %912 = vmatprep.subr.mxu0 %v1010_v1 }
  0xe8   :  { %878 = vmatpush3.msra.mxu1 %v41_v36  ;;  %913 = vmatpush3.msra.mxu0 %v64_v50 }
  0xe9   :  { %879 = vmatprep.subr.mxu1 %v1010_v1  ;;  %914 = vmatprep.subr.mxu0 %v1010_v1 }
  0xea   :  { %880 = vmatpush3.msra.mxu1 %v40_v37  ;;  %915 = vmatpush3.msra.mxu0 %v63_v51 }
  0xeb   :  { %881 = vmatprep.subr.mxu1 %v1010_v1  ;;  %916 = vmatprep.subr.mxu0 %v1010_v1 }
  0xec   :  { %882 = vmatpush3.msra.mxu1 %v39_v38  ;;  %917 = vmatpush3.msra.mxu0 %v62_v52 }
  0xed   :  { %883 = vmatprep.subr.mxu1 %v1010_v1  ;;  %918 = vmatprep.subr.mxu0 %v1010_v1 }
  0xee   :  { %884 = vmatpush3.msra.mxu1 %v38_v39  ;;  %919 = vmatpush3.msra.mxu0 %v61_v53 }
  0xef   :  { %885 = vmatprep.subr.mxu1 %v1010_v1  ;;  %920 = vmatprep.subr.mxu0 %v1010_v1 }
  0xf0   :  { %886 = vmatpush3.msra.mxu1 %v37_v40  ;;  %921 = vmatpush3.msra.mxu0 %v60_v54 }
  0xf1   :  { %887 = vmatprep.subr.mxu1 %v1010_v1  ;;  %922 = vmatprep.subr.mxu0 %v1010_v1 }
  0xf2   :  { %888 = vmatpush3.msra.mxu1 %v36_v41  ;;  %923 = vmatpush3.msra.mxu0 %v59_v55 }
  0xf3   :  { %889 = vmatprep.subr.mxu1 %v1010_v1  ;;  %924 = vmatprep.subr.mxu0 %v1010_v1 }
  0xf4   :  { %890 = vmatpush3.msra.mxu1 %v35_v42  ;;  %925 = vmatpush3.msra.mxu0 %v58_v56 }
  0xf5   :  { %891 = vmatprep.subr.mxu1 %v1010_v1  ;;  %926 = vmatprep.subr.mxu0 %v1010_v1 }
  0xf6   :  { %892 = vmatpush3.msra.mxu1 %v34_v43  ;;  %927 = vmatpush3.msra.mxu0 %v57_v57  ;;  %v1014_v43 = vmov 2   ;;  %v1015_v57 = vmov 127  }
  0xf7   :  { %893 = vmatprep.subr.mxu1 %v1010_v1  ;;  %928 = vmatprep.subr.mxu0 %v1010_v1 }
  0xf8   :  { %894 = vmatpush3.msra.mxu1 %v33_v45  ;;  %929 = vmatpush3.msra.mxu0 %v56_v58  ;;  %v763_v58 = vld [vmem:[#allocation2 + $0x120] ss:$0 sm:$0xff] }
  0xf9   :  { %896 = vmatmul.mubr.f32.vlgmr.msra.gmra.mxu1 %v387_v46  ;;  %930 = vmatprep.subr.mxu0 %v1010_v1 }
  0xfa   :  { %898 = vmatprep.mubr.msk.f32.mxu1 %vm1012_vm1, %v1010_v1  ;;  %931 = vmatpush3.msra.mxu0 %v55_v59 }
  0xfb   :  { %932 = vmatprep.subr.mxu0 %v1010_v1  ;;  %980 = vset.pattern.permute.xlu0 %v1014_v43 }
  0xfc   :  { %933 = vmatpush3.msra.mxu0 %v54_v60  ;;  %981 = vset.pattern.permute.xlu1 %v1014_v43 }
  0xfd   :  { %899 = vmatmul.mubr.f32.gmra.mxu1 %v388_v48  ;;  %934 = vmatprep.subr.mxu0 %v1010_v1 }
  0xfe   :  { %901 = vmatprep.mubr.msk.f32.mxu1 %vm1012_vm1, %v1010_v1  ;;  %935 = vmatpush3.msra.mxu0 %v53_v61 }
  0xff   :  { %936 = vmatprep.subr.mxu0 %v1010_v1 }
 0x100   :  { %937 = vmatpush3.msra.mxu0 %v52_v62 }
 0x101   :  { %938 = vmatprep.subr.mxu0 %v1010_v1 }
 0x102   :  { %939 = vmatpush3.msra.mxu0 %v51_v63 }
 0x103   :  { %940 = vmatprep.subr.mxu0 %v1010_v1 }
 0x104   :  { %941 = vmatpush3.msra.mxu0 %v50_v0 }
 0x199   :  { %v269_v2 = vpop.f32.mrf.mxu1 }
 0x19a   :  { %283 = vrot.lane.b32.xlu1 %v269_v2, %s1013_s0 }
 0x19b   :  { %v843_v3 = vpop.f32.mrf.mxu1  ;;  %v367_v4 = vpop.f32.mrf.mxu0 }
 0x19d   :  { %v274_v6 = vpop.f32.mrf.mxu1  ;;  %v856_v9 = vpop.f32.mrf.mxu0 }
 0x19e   :  { %285 = vrot.lane.b32.xlu0 %v274_v6, %s1013_s0 }
 0x19f   :  { %v846_v10 = vpop.f32.mrf.mxu1  ;;  %v372_v11 = vpop.f32.mrf.mxu0 }
 0x1a1   :  { %v279_v12 = vpop.f32.mrf.mxu1  ;;  %v859_v14 = vpop.f32.mrf.mxu0 }
 0x1a2   :  { %287 = vrot.lane.b32.xlu1 %v279_v12, %s1013_s0  ;;  %592 = vperm.xlu0 %980, %v1056_v7  }
 0x1a3   :  { %v849_v15 = vpop.f32.mrf.mxu1  ;;  %v377_v16 = vpop.f32.mrf.mxu0 }
 0x1a5   :  { %v862_v17 = vpop.f32.mrf.mxu0 }
 0x1a6   :  { %589 = vperm.xlu1 %981, %v1061_v8   ;;  %586 = vperm.xlu0 %980, %v1047_v5  }
 0x1aa   :  { %983 = vset.pattern.permute.xlu0 %v1015_v57  ;;  %982 = vset.pattern.permute.xlu1 %v1015_v57 }
 0x1b9   :  { %v462_v19 = vpop.f32.mrf.mxu1 }
 0x1ba   :  { %v463_v20 = vadd.f32 %v762_v18, %v462_v19 }
 0x1bb   :  { %v897_v21 = vpop.f32.mrf.mxu1 }
 0x1bc   :  { %v486_v22 = vmax.f32 %v463_v20, 0.0 }
 0x1bd   :  { %v467_v23 = vpop.f32.mrf.mxu1 }
 0x1be   :  { %v468_v25 = vadd.f32 %v762_v18, %v467_v23  ;;  %943 = vmatmul.mubr.f32.vlgmr.msra.gmra.mxu0 %v486_v22 }
 0x1bf   :  { %v900_v26 = vpop.f32.mrf.mxu1  ;;  %945 = vmatprep.mubr.msk.f32.mxu0 %vm1012_vm1, %v1010_v1 }
 0x1c0   :  { %v487_v27 = vmax.f32 %v468_v25, 0.0 }
 0x1c2   :  { %946 = vmatmul.mubr.f32.gmra.mxu0 %v487_v27 }
 0x1c3   :  { %948 = vmatprep.mubr.msk.f32.mxu0 %vm1012_vm1, %v1010_v1 }
 0x20c   :  { %v284_v30 = vpop.permute.xlu1 %283 }
 0x20d   :  { %v368_v31 = vadd.f32 %v367_v4, %v284_v30 }
 0x20f   :  { %v381_v32 = vsel %vm1170_vm11, %v368_v31, 0.0 }
 0x210   :  { %v389_v34 = vmax.f32 %v381_v32, 0.0  ;;  %v286_v35 = vpop.permute.xlu0 %285 }
 0x211   :  { %v373_v36 = vadd.f32 %v372_v11, %v286_v35 }
 0x212   :  { %902 = vmatmul.mubr.f32.gmra.mxu1 %v389_v34 }
 0x213   :  { %v382_v37 = vsel %vm1170_vm11, %v373_v36, 0.0  ;;  %904 = vmatprep.mubr.msk.f32.mxu1 %vm1012_vm1, %v1010_v1 }
 0x214   :  { %v390_v38 = vmax.f32 %v382_v37, 0.0  ;;  %v288_v39 = vpop.permute.xlu1 %287 }
 0x215   :  { %v378_v40 = vadd.f32 %v377_v16, %v288_v39 }
 0x216   :  { %905 = vmatmul.mubr.f32.gmra.mxu1 %v390_v38 }
 0x217   :  { %v383_v41 = vsel %vm1170_vm11, %v378_v40, 0.0  ;;  %907 = vmatprep.mubr.msk.f32.mxu1 %vm1012_vm1, %v1010_v1 }
 0x218   :  { %v391_v42 = vmax.f32 %v383_v41, 0.0 }
 0x21a   :  { %908 = vmatmul.mubr.f32.gmra.mxu1 %v391_v42 }
 0x21d   :  { %v593_v6 = vpop.permute.xlu0 %592 }
 0x21e   :  { %vm596_vm12 = vcmp.eq.s32.totalorder %v593_v6, %v1074_v13 }
 0x21f   :  { %v766_v12 = vsel %vm596_vm12, 1.0, %v1010_v1 }
 0x221   :  { %v590_v9 = vpop.permute.xlu1 %589  ;;  %v587_v10 = vpop.permute.xlu0 %586 }
 0x222   :  { %vm594_vm13 = vcmp.eq.s32.totalorder %v587_v10, %v1074_v13  ;;  %vm595_vm14 = vcmp.eq.s32.totalorder %v590_v9, %v1074_v13 }
 0x27e   :  { %v1187_v44 = vpop.f32.mrf.mxu0 }
 0x27f   :  { %v562_v21 = vadd.f32 %v763_v58, %v1187_v44 }
 0x280   :  { %v944_v45 = vpop.f32.mrf.mxu0 }
 0x281   :  { %v736_v26 = vsel %vm735_vm0, 0.0, %v562_v21 }
 0x282   :  { %v1189_v46 = vpop.f32.mrf.mxu0 }
 0x283   :  { %v567_v20 = vadd.f32 %v763_v58, %v1189_v46 }
 0x284   :  { %v947_v47 = vpop.f32.mrf.mxu0 }
 0x285   :  { %v737_v22 = vsel %vm735_vm0, 0.0, %v567_v20 }
 0x2d2   :  { %v472_v48 = vpop.f32.mrf.mxu1 }
 0x2d3   :  { %v473_v49 = vadd.f32 %v762_v18, %v472_v48 }
 0x2d4   :  { %v903_v50 = vpop.f32.mrf.mxu1 }
 0x2d5   :  { %v488_v51 = vmax.f32 %v473_v49, 0.0 }
 0x2d6   :  { %v477_v52 = vpop.f32.mrf.mxu1 }
 0x2d7   :  { %v478_v53 = vadd.f32 %v762_v18, %v477_v52  ;;  %949 = vmatmul.mubr.f32.gmra.mxu0 %v488_v51 }
 0x2d8   :  { %v906_v54 = vpop.f32.mrf.mxu1  ;;  %951 = vmatprep.mubr.msk.f32.mxu0 %vm1012_vm1, %v1010_v1 }
 0x2d9   :  { %v489_v7 = vmax.f32 %v478_v53, 0.0 }
 0x2da   :  { %v482_v8 = vpop.f32.mrf.mxu1 }
 0x2db   :  { %v483_v5 = vadd.f32 %v762_v18, %v482_v8  ;;  %952 = vmatmul.mubr.f32.gmra.mxu0 %v489_v7 }
 0x2dc   :  { %v909_v55 = vpop.f32.mrf.mxu1  ;;  %954 = vmatprep.mubr.msk.f32.mxu0 %vm1012_vm1, %v1010_v1 }
 0x2dd   :  { %v490_v56 = vmax.f32 %v483_v5, 0.0 }
 0x2df   :  { %955 = vmatmul.mubr.f32.gmra.mxu0 %v490_v56 }
 0x397   :  { %v571_v59 = vpop.f32.mrf.mxu0 }
 0x398   :  { %v572_v60 = vadd.f32 %v763_v58, %v571_v59 }
 0x399   :  { %v950_v61 = vpop.f32.mrf.mxu0 }
 0x39a   :  { %605 = vperm.xlu0 %983, %v572_v60  }
 0x39b   :  { %v576_v62 = vpop.f32.mrf.mxu0 }
 0x39c   :  { %v577_v63 = vadd.f32 %v763_v58, %v576_v62 }
 0x39d   :  { %v953_v0 = vpop.f32.mrf.mxu0 }
 0x39e   :  { %610 = vperm.xlu1 %982, %v577_v63  }
 0x39f   :  { %v581_v2 = vpop.f32.mrf.mxu0 }
 0x3a0   :  { %v582_v3 = vadd.f32 %v763_v58, %v581_v2 }
 0x3a1   :  { %v956_v4 = vpop.f32.mrf.mxu0 }
 0x3a2   :  { %615 = vperm.xlu1 %982, %v582_v3  }
 0x3cb   :  { %621 = vxpose.xlu1.b32.start [1/3] (short) (narrow) %v1090_v24, 16  ;;  %v764_v24 = vsel %vm594_vm13, 1.0, %v1010_v1 }
 0x3cf   :  { %622 = vxpose.xlu1.b32.cont [2/3] (short) (narrow) %v1104_v29, 16  ;;  %v765_v29 = vsel %vm595_vm14, 1.0, %v1010_v1 }
 0x3d3   :  { %623 = vxpose.xlu1.b32.end [3/3] (short) (narrow) %v1118_v33, 16 }
 0x415   :  { %v606_v16 = vpop.permute.xlu0 %605 }
 0x416   :  { %v618_v17 = vmul.f32 %v764_v24, %v606_v16 }
 0x419   :  { %v611_v11 = vpop.permute.xlu1 %610 }
 0x41a   :  { %v619_v33 = vmul.f32 %v765_v29, %v611_v11 }
 0x41d   :  { %v616_v14 = vpop.permute.xlu1 %615 }
 0x41e   :  { %v620_v15 = vmul.f32 %v766_v12, %v616_v14 }
 0x420   :  { %957 = vmatprep.subr.mxu1 %v620_v15 }
 0x421   :  { %958 = vmatpush3.msra.mxu1 %v620_v15 }
 0x422   :  { %959 = vmatprep.subr.mxu1 %v619_v33 }
 0x423   :  { %960 = vmatpush3.msra.mxu1 %v619_v33 }
 0x424   :  { %961 = vmatprep.subr.mxu1 %v618_v17 }
 0x425   :  { %962 = vmatpush3.msra.mxu1 %v618_v17 }
 0x447   :  { %v637_v18 = vpop.trf.xlu1 }
 0x448   :  { %963 = vmatprep.mubr.msk.f32.mxu1 %vm653_vm15, %v637_v18 }
 0x44b   :  { %v638_v19 = vpop.trf.xlu1 }
 0x44c   :  { %964 = vmatmul.mubr.msk.f32.vlgmr.msra.gmra.mxu1 %vm653_vm15, %v638_v19 }
 0x50c   :  { %v965_v1 = vpop.f32.mrf.mxu1 }
 0x50d   :  { %v739_v23 = vadd.f32 %v965_v1, %v737_v22 }
 0x50e   :  { %v726_v25 = vpop.f32.mrf.mxu1 }
 0x50f   :  { %741 = vst [vmem:[%s1216_s3 + $0x8] sm:$0xff] %v739_v23  ;;  %v738_v27 = vadd.f32 %v736_v26, %v726_v25 }
 0x511   :  { %740 = vst [vmem:[%s1216_s3] sm:$0xff] %v738_v27 }
 0x512   :  { %746 = vsyncpa [#allocation3], 1 }

</bundles_post_ra>
